<compile_context>
chip_gen: v5e
topology: v5e:2x2
jax: 0.10.0
libtpu: 0.0.40
codegen_flags: <defaults>
</compile_context>

<pallas_src>
import jax
import jax.numpy as jnp
from jax.experimental import pallas as pl
from jax.experimental.pallas import tpu as pltpu


# ----------------------------------------------------------------------------- helpers
def _round_up(x, m):
    return ((x + m - 1) // m) * m


def _cdiv(a, b):
    return -(-a // b)


def _vmem_capacity_bytes():
    try:
        cap = getattr(pltpu.get_tpu_info(), "vmem_capacity_bytes", None)
        if cap:
            return int(cap)
    except Exception:
        pass
    return 64 << 20  # conservative fallback (v7x per-TC VMEM)


def _silu(v):
    return v * jax.nn.sigmoid(v)


# ----------------------------------------------------------------------------- kernels
def _make_kernels(e_true, Ep):
    """Build the resident-weights kernel and the MLP-K-tiled kernel for a given lane padding."""
    padded = Ep != e_true
    inv_e = 1.0 / float(e_true)

    def _rms(v):
        # pad lanes are zero, so the sum equals the true sum; divide by the true E, not Ep.
        return v * jax.lax.rsqrt(jnp.sum(v * v, axis=-1, keepdims=True) * inv_e)

    def _attn_residual(x, w1q, ones_ph, head_bcast, w2):
        """x + attention(rms_norm(x)) on an (R, Ep) slab, fully lane-dense."""
        xn = _rms(x)
        q = jnp.dot(xn.astype(jnp.bfloat16), w1q, preferred_element_type=jnp.float32)
        # Per-head softmax over the head dim.  The row max is a constant shift within every head,
        # so it is an exact per-head shift (softmax is shift-invariant).
        # TODO(synk): for arbitrarily scaled weights a true per-head max would be needed to rule
        # out exp underflow; with RMS-normed inputs and the folded 1/4 scale the spread is tiny.
        e = jnp.exp(q - jnp.max(q, axis=-1, keepdims=True))
        if padded:
            lane = jax.lax.broadcasted_iota(jnp.int32, (1, Ep), 1)
            mask = (lane < e_true).astype(jnp.float32)
            e = e * mask                                   # pad lanes contribute nothing
        # Per-head denominators via two thin matmuls (E*H MACs each) instead of an (E,E) mask.
        denom_h = jnp.dot(e.astype(jnp.bfloat16), ones_ph,
                          preferred_element_type=jnp.float32)          # (R, Hp)
        denom = jnp.dot(denom_h.astype(jnp.bfloat16), head_bcast,
                        preferred_element_type=jnp.float32)            # (R, Ep)
        if padded:
            denom = denom + (1.0 - mask)                   # pad lanes: e==0, denom==1 -> attn==0
        attn = e * pl.reciprocal(denom, approx=True)
        proj = jnp.dot(attn.astype(jnp.bfloat16), w2, preferred_element_type=jnp.float32)
        return x + proj

    # ---- path A: all weights resident in VMEM (Buffered(1)), one grid axis over row tiles ----
    def resident_kernel(x_ref, w1q_ref, oph_ref, bc_ref, w2_ref,
                        w3_ref, b3_ref, w4_ref, b4_ref, o_ref):
        x = x_ref[...].astype(jnp.float32)
        x1 = _attn_residual(x, w1q_ref[...], oph_ref[...], bc_ref[...], w2_ref[...])
        xn1 = _rms(x1).astype(jnp.bfloat16)
        h1 = _silu(jnp.dot(xn1, w3_ref[...], preferred_element_type=jnp.float32) + b3_ref[...])
        h2 = _silu(jnp.dot(h1.astype(jnp.bfloat16), w4_ref[...],
                           preferred_element_type=jnp.float32) + b4_ref[...])
        o_ref[...] = (x1 + h2).astype(o_ref.dtype)

    # ---- path B: MLP K-tiled over the 3E hidden dim (w3/w4 streamed), for large E / v7x ----
    def ktiled_kernel(x_ref, w1q_ref, oph_ref, bc_ref, w2_ref,
                      w3_ref, b3_ref, w4_ref, b4_ref, o_ref,
                      acc_ref, x1_ref, xn1_ref):
        k = pl.program_id(1)

        @pl.when(k == 0)
        def _():
            x = x_ref[...].astype(jnp.float32)
            x1 = _attn_residual(x, w1q_ref[...], oph_ref[...], bc_ref[...], w2_ref[...])
            x1_ref[...] = x1
            xn1_ref[...] = _rms(x1).astype(jnp.bfloat16)
            acc_ref[...] = jnp.zeros_like(acc_ref)

        # silu is elementwise on h1, so each hidden-dim block is independent and can be
        # accumulated into h1 @ w4 immediately.
        h1 = _silu(jnp.dot(xn1_ref[...], w3_ref[...],
                           preferred_element_type=jnp.float32) + b3_ref[...])
        acc_ref[...] += jnp.dot(h1.astype(jnp.bfloat16), w4_ref[...],
                                preferred_element_type=jnp.float32)

        @pl.when(k == pl.num_programs(1) - 1)
        def _():
            o_ref[...] = (x1_ref[...] + _silu(acc_ref[...] + b4_ref[...])).astype(o_ref.dtype)

    return resident_kernel, ktiled_kernel


# ----------------------------------------------------------------------------- planning
def _plan(N, E, heads, *, force_path=None, force_tk=None):
    Ep = _round_up(E, 128)
    Hp = _round_up(heads, 128)
    F = 3 * E
    Fp0 = _round_up(F, 128)

    cap = _vmem_capacity_bytes()
    budget = int(cap * 0.88) - (6 << 20)

    thin = 2 * (2 * Ep * Hp) + 4 * (Fp0 + 2 * Ep)          # head matrices (bf16) + biases (f32)

    def res_bytes(tr):
        w = 2 * (2 * Ep * Ep + 2 * Ep * Fp0) + thin        # bf16 weights, Buffered(1)
        a = tr * (32 * Ep + 6 * Fp0)                       # 2x-buffered x/out tiles + temporaries
        return w + a

    # Largest 128-multiple that divides Fp0 (keeps the hidden-dim padding at zero), capped at 512.
    TK = 128
    for cand in (512, 384, 256, 128):
        if cand <= Fp0 and Fp0 % cand == 0:
            TK = cand
            break

    def kt_bytes(tr, tk):
        w = 2 * (2 * Ep * Ep) + thin                       # resident w1q + w2
        s = 2 * (2 * (Ep * tk + tk * Ep) + 4 * tk)         # double-buffered w3/w4/b3 blocks
        a = tr * (42 * Ep + 6 * tk)                        # tiles + attn temps + scratches + h1
        return w + s + a

    path, TR = None, 128
    for tr in (512, 256, 128):
        if res_bytes(tr) <= budget:
            path, TR = "resident", tr
            break
    if path is None:
        path = "ktiled"
        for tr in (256, 128, 64):
            if kt_bytes(tr, TK) <= budget:
                TR = tr
                break
        else:
            TR = 64
            # TODO(synk): for extreme E (> ~3k on v7x) also K-tile w1q/w2 over the embedding dim.

    if force_path is not None:
        path = force_path
    if force_tk is not None:
        TK = force_tk

    # Keep enough row tiles for both TensorCores to pipeline, then cap by the row count.
    while TR > 64 and _cdiv(N, TR) < 8:
        TR //= 2
    TR = min(TR, _round_up(N, 8))

    Fp = _round_up(F, TK) if path == "ktiled" else Fp0
    est = res_bytes(TR) if path == "resident" else kt_bytes(TR, TK)
    vmem_limit = min(int(cap * 0.92), max(32 << 20, est + (est >> 1)))
    return dict(path=path, TR=TR, TK=TK, Ep=Ep, Hp=Hp, Fp=Fp, vmem_limit=vmem_limit)


# ----------------------------------------------------------------------------- wrapper
def transformer_block(x, params, *, heads, force_path=None, force_tk=None):
    B, S, E = x.shape
    assert E % heads == 0, "embedding_dimension must be divisible by heads"
    w1, w2, w3, b3, w4, b4 = params
    dh = E // heads
    N = B * S

    plan = _plan(N, E, heads, force_path=force_path, force_tk=force_tk)
    path, TR, TK = plan["path"], plan["TR"], plan["TK"]
    Ep, Hp, Fp = plan["Ep"], plan["Hp"], plan["Fp"]

    # ---- one-time host-side weight prep: fold q scale, drop dead K/V columns, pad, cast ----
    def pad2(a, r, c):
        return jnp.pad(a, ((0, r - a.shape[0]), (0, c - a.shape[1])))

    w1q = pad2(w1[:, :E] * 0.25, Ep, Ep).astype(jnp.bfloat16)   # only Q columns survive
    w2p = pad2(w2, Ep, Ep).astype(jnp.bfloat16)
    w3p = pad2(w3, Ep, Fp).astype(jnp.bfloat16)
    b3p = pad2(b3, 1, Fp).astype(jnp.float32)
    w4p = pad2(w4, Fp, Ep).astype(jnp.bfloat16)
    b4p = pad2(b4, 1, Ep).astype(jnp.float32)

    lane = jnp.arange(Ep)
    hid = jnp.where(lane < E, lane // dh, -1)                   # -1 marks pad lanes
    ones_ph = (hid[:, None] == jnp.arange(Hp)[None, :]).astype(jnp.bfloat16)     # (Ep, Hp)
    head_bcast = (jnp.arange(Hp)[:, None] == hid[None, :]).astype(jnp.bfloat16)  # (Hp, Ep)

    # ---- activations: flatten tokens, pad rows to a TR multiple and lanes to Ep ----
    Np = _round_up(N, TR)
    xp = jnp.pad(x.reshape(N, E).astype(jnp.float32), ((0, Np - N), (0, Ep - E)))
    G = Np // TR

    resident_kernel, ktiled_kernel = _make_kernels(E, Ep)

    def const_spec(shape, nd):
        # Constant-index (fully resident) blocks: a single VMEM buffer is enough.
        if nd == 1:
            return pl.BlockSpec(shape, lambda i: (0, 0), pipeline_mode=pl.Buffered(1))
        return pl.BlockSpec(shape, lambda i, k: (0, 0), pipeline_mode=pl.Buffered(1))

    if path == "resident":
        grid = (G,)
        in_specs = [
            pl.BlockSpec((TR, Ep), lambda i: (i, 0)),           # activations (streamed)
            const_spec((Ep, Ep), 1),                            # w1 Q-columns (scaled, bf16)
            const_spec((Ep, Hp), 1),                            # per-head ones
            const_spec((Hp, Ep), 1),                            # head broadcast-back
            const_spec((Ep, Ep), 1),                            # w2
            const_spec((Ep, Fp), 1),                            # w3
            const_spec((1, Fp), 1),                             # b3
            const_spec((Fp, Ep), 1),                            # w4
            const_spec((1, Ep), 1),                             # b4
        ]
        out_specs = pl.BlockSpec((TR, Ep), lambda i: (i, 0))
        scratch = ()
        dims = ("parallel",)
        kernel = resident_kernel
    else:
        KT = Fp // TK
        grid = (G, KT)
        in_specs = [
            pl.BlockSpec((TR, Ep), lambda i, k: (i, 0)),
            const_spec((Ep, Ep), 2),
            const_spec((Ep, Hp), 2),
            const_spec((Hp, Ep), 2),
            const_spec((Ep, Ep), 2),
            pl.BlockSpec((Ep, TK), lambda i, k: (0, k)),        # w3 streamed over hidden dim
            pl.BlockSpec((1, TK), lambda i, k: (0, k)),         # b3 streamed
            pl.BlockSpec((TK, Ep), lambda i, k: (k, 0)),        # w4 streamed
            const_spec((1, Ep), 2),
        ]
        out_specs = pl.BlockSpec((TR, Ep), lambda i, k: (i, 0))
        scratch = (pltpu.VMEM((TR, Ep), jnp.float32),           # h1 @ w4 accumulator
                   pltpu.VMEM((TR, Ep), jnp.float32),           # x1 stash (attention residual)
                   pltpu.VMEM((TR, Ep), jnp.bfloat16))          # rms_norm(x1) stash (MLP input)
        dims = ("parallel", "arbitrary")
        kernel = ktiled_kernel

    out = pl.pallas_call(
        kernel,
        out_shape=jax.ShapeDtypeStruct((Np, Ep), x.dtype),
        grid=grid,
        in_specs=in_specs,
        out_specs=out_specs,
        scratch_shapes=scratch,
        compiler_params=pltpu.CompilerParams(
            dimension_semantics=dims,
            vmem_limit_bytes=plan["vmem_limit"],
        ),
    )(xp, w1q, ones_ph, head_bcast, w2p, w3p, b3p, w4p, b4p)

    return out[:N, :E].reshape(B, S, E)


# ------------------------------------------------------------- pure-JAX f32 reference
def reference_block(x, params, *, heads):
    w1, w2, w3, b3, w4, b4 = params
    B, S, E = x.shape
    dh = E // heads

    def rms(v):
        return v / jnp.sqrt(jnp.mean(jnp.square(v), axis=-1, keepdims=True))

    def attn(xn):
        qkv = xn @ w1                                      # (B, S, 3E)
        qkv = qkv.reshape(B, S, 3, heads, dh)              # '(n h e)'
        q = jnp.transpose(qkv[:, :, 0], (0, 2, 1, 3))
        k = jnp.transpose(qkv[:, :, 1], (0, 2, 1, 3))
        v = jnp.transpose(qkv[:, :, 2], (0, 2, 1, 3))
        score = jax.nn.softmax(jnp.einsum('bhnk,bhnc->bhkc', k / 4, v), axis=-1)
        a = jax.nn.softmax(jnp.einsum('bhnk,bhkc->bhnk', q / 4, score), axis=-1)
        a = jnp.transpose(a, (0, 2, 1, 3)).reshape(B, S, E)
        return a @ w2

    def mlp(xn):
        h1 = jax.nn.silu(xn @ w3 + b3[0])
        return jax.nn.silu(h1 @ w4 + b4[0])

    x = x + attn(rms(x))
    x = x + mlp(rms(x))
    return x


def _make_params(key, E):
    k_w1, k_w2, k_w3, k_b3, k_w4, k_b4 = jax.random.split(key, 6)

    def init(k, shape, fan_in):
        bound = 1.0 / jnp.sqrt(fan_in)
        return jax.random.uniform(k, shape, jnp.float32, -bound, bound)

    # weights stored already transposed: (in, out)
    w1 = init(k_w1, (E, 3 * E), E)
    w2 = init(k_w2, (E, E), E)
    w3 = init(k_w3, (E, 3 * E), E)
    b3 = init(k_b3, (1, 3 * E), E)
    w4 = init(k_w4, (3 * E, E), 3 * E)
    b4 = init(k_b4, (1, E), 3 * E)
    return (w1, w2, w3, b3, w4, b4)


if __name__ == "__main__":
    key = jax.random.PRNGKey(0)
    k1, k2, kx1, kx2 = jax.random.split(key, 4)

    # Case 1: resident-weights path (E=32 also exercises the lane padding 32 -> 128).
    B, S, E, H = 2, 8, 32, 4
    x = jax.random.normal(kx1, (B, S, E), dtype=jnp.float32)
    params = _make_params(k1, E)
    out = jax.block_until_ready(transformer_block(x, params, heads=H))
    ref = reference_block(x, params, heads=H)
    assert out.shape == (B, S, E)
    # bf16 MXU matmuls + approx EUP reciprocal vs an all-f32 reference -> loosened tolerance.
    assert jnp.allclose(out, ref, rtol=2e-2, atol=2e-2), "resident path mismatch vs reference"

    # Case 2: MLP-K-tiled path (forced; validates the large-E / v7x code path at small shapes).
    B2, S2, E2, H2 = 2, 8, 128, 4
    x2 = jax.random.normal(kx2, (B2, S2, E2), dtype=jnp.float32)
    params2 = _make_params(k2, E2)
    out2 = jax.block_until_ready(
        transformer_block(x2, params2, heads=H2, force_path="ktiled", force_tk=128))
    ref2 = reference_block(x2, params2, heads=H2)
    assert out2.shape == (B2, S2, E2)
    assert jnp.allclose(out2, ref2, rtol=2e-2, atol=2e-2), "k-tiled path mismatch vs reference"

    print("KERNEL_OK")
</pallas_src>

<mosaic_0001>
module attributes {stable_mosaic.version = 11 : i64} {
  func.func @resident_kernel(%arg0: i32, %arg1: memref<16x128xf32, #tpu.memory_space<vmem>>, %arg2: memref<128x128xbf16, #tpu.memory_space<vmem>>, %arg3: memref<128x128xbf16, #tpu.memory_space<vmem>>, %arg4: memref<128x128xbf16, #tpu.memory_space<vmem>>, %arg5: memref<128x128xbf16, #tpu.memory_space<vmem>>, %arg6: memref<128x128xbf16, #tpu.memory_space<vmem>>, %arg7: memref<1x128xf32, #tpu.memory_space<vmem>>, %arg8: memref<128x128xbf16, #tpu.memory_space<vmem>>, %arg9: memref<1x128xf32, #tpu.memory_space<vmem>>, %arg10: memref<16x128xf32, #tpu.memory_space<vmem>>) attributes {dimension_semantics = [#tpu.dimension_semantics<parallel>], iteration_bounds = array<i64: 1>, scalar_prefetch = 0 : i64, scratch_operands = 0 : i64, tpu.core_type = #tpu.core_type<tc>, window_params = [{transform_indices = @transform_0, window_bounds = array<i64: 16, 128>}, {pipeline_mode = #tpu.pipeline_mode<synchronous>, transform_indices = @transform_1, window_bounds = array<i64: 128, 128>}, {pipeline_mode = #tpu.pipeline_mode<synchronous>, transform_indices = @transform_2, window_bounds = array<i64: 128, 128>}, {pipeline_mode = #tpu.pipeline_mode<synchronous>, transform_indices = @transform_3, window_bounds = array<i64: 128, 128>}, {pipeline_mode = #tpu.pipeline_mode<synchronous>, transform_indices = @transform_4, window_bounds = array<i64: 128, 128>}, {pipeline_mode = #tpu.pipeline_mode<synchronous>, transform_indices = @transform_5, window_bounds = array<i64: 128, 128>}, {pipeline_mode = #tpu.pipeline_mode<synchronous>, transform_indices = @transform_6, window_bounds = array<i64: 1, 128>}, {pipeline_mode = #tpu.pipeline_mode<synchronous>, transform_indices = @transform_7, window_bounds = array<i64: 128, 128>}, {pipeline_mode = #tpu.pipeline_mode<synchronous>, transform_indices = @transform_8, window_bounds = array<i64: 1, 128>}, {transform_indices = @transform_9, window_bounds = array<i64: 16, 128>}]} {
    %c0 = arith.constant 0 : index
    %c0_0 = arith.constant 0 : index
    %0 = vector.load %arg1[%c0, %c0_0] : memref<16x128xf32, #tpu.memory_space<vmem>>, vector<16x128xf32>
    %c0_1 = arith.constant 0 : index
    %c0_2 = arith.constant 0 : index
    %1 = vector.load %arg2[%c0_1, %c0_2] : memref<128x128xbf16, #tpu.memory_space<vmem>>, vector<128x128xbf16>
    %c0_3 = arith.constant 0 : index
    %c0_4 = arith.constant 0 : index
    %2 = vector.load %arg3[%c0_3, %c0_4] : memref<128x128xbf16, #tpu.memory_space<vmem>>, vector<128x128xbf16>
    %c0_5 = arith.constant 0 : index
    %c0_6 = arith.constant 0 : index
    %3 = vector.load %arg4[%c0_5, %c0_6] : memref<128x128xbf16, #tpu.memory_space<vmem>>, vector<128x128xbf16>
    %c0_7 = arith.constant 0 : index
    %c0_8 = arith.constant 0 : index
    %4 = vector.load %arg5[%c0_7, %c0_8] : memref<128x128xbf16, #tpu.memory_space<vmem>>, vector<128x128xbf16>
    %5 = arith.mulf %0, %0 : vector<16x128xf32>
    %cst = arith.constant dense<0.000000e+00> : vector<16xf32>
    %6 = vector.multi_reduction <add>, %5, %cst [1] : vector<16x128xf32> to vector<16xf32>
    %7 = vector.shape_cast %6 : vector<16xf32> to vector<16x1xf32>
    %cst_9 = arith.constant 3.125000e-02 : f32
    %8 = vector.broadcast %cst_9 : f32 to vector<16x1xf32>
    %9 = arith.mulf %7, %8 : vector<16x1xf32>
    %10 = math.rsqrt %9 : vector<16x1xf32>
    %11 = vector.broadcast %10 : vector<16x1xf32> to vector<16x128xf32>
    %12 = arith.mulf %0, %11 : vector<16x128xf32>
    %13 = arith.truncf %12 : vector<16x128xf32> to vector<16x128xbf16>
    %cst_10 = arith.constant dense<0.000000e+00> : vector<16x128xf32>
    %14 = tpu.matmul %13, %1, %cst_10 {dimension_numbers = #tpu.dot_dimension_numbers<[1], [0], [0], [1], [0, 0, 1, 1], [], []>} : vector<16x128xbf16>, vector<128x128xbf16>, vector<16x128xf32> -> vector<16x128xf32>
    %cst_11 = arith.constant dense<0xFF800000> : vector<16xf32>
    %15 = vector.multi_reduction <maximumf>, %14, %cst_11 [1] : vector<16x128xf32> to vector<16xf32>
    %16 = vector.shape_cast %15 : vector<16xf32> to vector<16x1xf32>
    %17 = vector.broadcast %16 : vector<16x1xf32> to vector<16x128xf32>
    %18 = arith.subf %14, %17 : vector<16x128xf32>
    %19 = math.exp %18 : vector<16x128xf32>
    %20 = tpu.iota {dimensions = array<i32: 1>} : vector<1x128xi32>
    %c32_i32 = arith.constant 32 : i32
    %21 = vector.broadcast %c32_i32 : i32 to vector<1x128xi32>
    %22 = arith.cmpi slt, %20, %21 : vector<1x128xi32>
    %23 = arith.extui %22 : vector<1x128xi1> to vector<1x128xi32>
    %24 = arith.sitofp %23 : vector<1x128xi32> to vector<1x128xf32>
    %25 = vector.broadcast %24 : vector<1x128xf32> to vector<16x128xf32>
    %26 = arith.mulf %19, %25 : vector<16x128xf32>
    %27 = arith.truncf %26 : vector<16x128xf32> to vector<16x128xbf16>
    %cst_12 = arith.constant dense<0.000000e+00> : vector<16x128xf32>
    %28 = tpu.matmul %27, %2, %cst_12 {dimension_numbers = #tpu.dot_dimension_numbers<[1], [0], [0], [1], [0, 0, 1, 1], [], []>} : vector<16x128xbf16>, vector<128x128xbf16>, vector<16x128xf32> -> vector<16x128xf32>
    %29 = arith.truncf %28 : vector<16x128xf32> to vector<16x128xbf16>
    %cst_13 = arith.constant dense<0.000000e+00> : vector<16x128xf32>
    %30 = tpu.matmul %29, %3, %cst_13 {dimension_numbers = #tpu.dot_dimension_numbers<[1], [0], [0], [1], [0, 0, 1, 1], [], []>} : vector<16x128xbf16>, vector<128x128xbf16>, vector<16x128xf32> -> vector<16x128xf32>
    %cst_14 = arith.constant 1.000000e+00 : f32
    %31 = vector.broadcast %cst_14 : f32 to vector<1x128xf32>
    %32 = arith.subf %31, %24 : vector<1x128xf32>
    %33 = vector.broadcast %32 : vector<1x128xf32> to vector<16x128xf32>
    %34 = arith.addf %30, %33 : vector<16x128xf32>
    %35 = tpu.reciprocal %34 {approx = true} : vector<16x128xf32> -> vector<16x128xf32>
    %36 = arith.mulf %26, %35 : vector<16x128xf32>
    %37 = arith.truncf %36 : vector<16x128xf32> to vector<16x128xbf16>
    %cst_15 = arith.constant dense<0.000000e+00> : vector<16x128xf32>
    %38 = tpu.matmul %37, %4, %cst_15 {dimension_numbers = #tpu.dot_dimension_numbers<[1], [0], [0], [1], [0, 0, 1, 1], [], []>} : vector<16x128xbf16>, vector<128x128xbf16>, vector<16x128xf32> -> vector<16x128xf32>
    %39 = arith.addf %0, %38 : vector<16x128xf32>
    %40 = arith.mulf %39, %39 : vector<16x128xf32>
    %cst_16 = arith.constant dense<0.000000e+00> : vector<16xf32>
    %41 = vector.multi_reduction <add>, %40, %cst_16 [1] : vector<16x128xf32> to vector<16xf32>
    %42 = vector.shape_cast %41 : vector<16xf32> to vector<16x1xf32>
    %cst_17 = arith.constant 3.125000e-02 : f32
    %43 = vector.broadcast %cst_17 : f32 to vector<16x1xf32>
    %44 = arith.mulf %42, %43 : vector<16x1xf32>
    %45 = math.rsqrt %44 : vector<16x1xf32>
    %46 = vector.broadcast %45 : vector<16x1xf32> to vector<16x128xf32>
    %47 = arith.mulf %39, %46 : vector<16x128xf32>
    %48 = arith.truncf %47 : vector<16x128xf32> to vector<16x128xbf16>
    %c0_18 = arith.constant 0 : index
    %c0_19 = arith.constant 0 : index
    %49 = vector.load %arg6[%c0_18, %c0_19] : memref<128x128xbf16, #tpu.memory_space<vmem>>, vector<128x128xbf16>
    %cst_20 = arith.constant dense<0.000000e+00> : vector<16x128xf32>
    %50 = tpu.matmul %48, %49, %cst_20 {dimension_numbers = #tpu.dot_dimension_numbers<[1], [0], [0], [1], [0, 0, 1, 1], [], []>} : vector<16x128xbf16>, vector<128x128xbf16>, vector<16x128xf32> -> vector<16x128xf32>
    %c0_21 = arith.constant 0 : index
    %c0_22 = arith.constant 0 : index
    %51 = vector.load %arg7[%c0_21, %c0_22] : memref<1x128xf32, #tpu.memory_space<vmem>>, vector<1x128xf32>
    %52 = vector.broadcast %51 : vector<1x128xf32> to vector<16x128xf32>
    %53 = arith.addf %50, %52 : vector<16x128xf32>
    %54 = arith.negf %53 : vector<16x128xf32>
    %55 = math.exp %54 : vector<16x128xf32>
    %cst_23 = arith.constant 1.000000e+00 : f32
    %56 = vector.broadcast %cst_23 : f32 to vector<16x128xf32>
    %57 = arith.addf %56, %55 : vector<16x128xf32>
    %58 = arith.divf %56, %57 : vector<16x128xf32>
    %59 = arith.mulf %53, %58 : vector<16x128xf32>
    %60 = arith.truncf %59 : vector<16x128xf32> to vector<16x128xbf16>
    %c0_24 = arith.constant 0 : index
    %c0_25 = arith.constant 0 : index
    %61 = vector.load %arg8[%c0_24, %c0_25] : memref<128x128xbf16, #tpu.memory_space<vmem>>, vector<128x128xbf16>
    %cst_26 = arith.constant dense<0.000000e+00> : vector<16x128xf32>
    %62 = tpu.matmul %60, %61, %cst_26 {dimension_numbers = #tpu.dot_dimension_numbers<[1], [0], [0], [1], [0, 0, 1, 1], [], []>} : vector<16x128xbf16>, vector<128x128xbf16>, vector<16x128xf32> -> vector<16x128xf32>
    %c0_27 = arith.constant 0 : index
    %c0_28 = arith.constant 0 : index
    %63 = vector.load %arg9[%c0_27, %c0_28] : memref<1x128xf32, #tpu.memory_space<vmem>>, vector<1x128xf32>
    %64 = vector.broadcast %63 : vector<1x128xf32> to vector<16x128xf32>
    %65 = arith.addf %62, %64 : vector<16x128xf32>
    %66 = arith.negf %65 : vector<16x128xf32>
    %67 = math.exp %66 : vector<16x128xf32>
    %cst_29 = arith.constant 1.000000e+00 : f32
    %68 = vector.broadcast %cst_29 : f32 to vector<16x128xf32>
    %69 = arith.addf %68, %67 : vector<16x128xf32>
    %70 = arith.divf %68, %69 : vector<16x128xf32>
    %71 = arith.mulf %65, %70 : vector<16x128xf32>
    %72 = arith.addf %39, %71 : vector<16x128xf32>
    %c0_30 = arith.constant 0 : index
    %c0_31 = arith.constant 0 : index
    %73 = vector.load %arg10[%c0_30, %c0_31] : memref<16x128xf32, #tpu.memory_space<vmem>>, vector<16x128xf32>
    tpu.vector_store %arg10[%c0_30, %c0_31], %72 {strides = array<i32>} : memref<16x128xf32, #tpu.memory_space<vmem>>, vector<16x128xf32>,
    return
  }
  func.func @transform_0(%arg0: i32) -> (i32, i32) {
    %c0_i32 = arith.constant 0 : i32
    %c0_i32_0 = arith.constant 0 : i32
    return %arg0, %c0_i32 : i32, i32
  }
  func.func @transform_1(%arg0: i32) -> (i32, i32) {
    %c0_i32 = arith.constant 0 : i32
    %c0_i32_0 = arith.constant 0 : i32
    %c0_i32_1 = arith.constant 0 : i32
    return %c0_i32, %c0_i32_0 : i32, i32
  }
  func.func @transform_2(%arg0: i32) -> (i32, i32) {
    %c0_i32 = arith.constant 0 : i32
    %c0_i32_0 = arith.constant 0 : i32
    %c0_i32_1 = arith.constant 0 : i32
    return %c0_i32, %c0_i32_0 : i32, i32
  }
  func.func @transform_3(%arg0: i32) -> (i32, i32) {
    %c0_i32 = arith.constant 0 : i32
    %c0_i32_0 = arith.constant 0 : i32
    %c0_i32_1 = arith.constant 0 : i32
    return %c0_i32, %c0_i32_0 : i32, i32
  }
  func.func @transform_4(%arg0: i32) -> (i32, i32) {
    %c0_i32 = arith.constant 0 : i32
    %c0_i32_0 = arith.constant 0 : i32
    %c0_i32_1 = arith.constant 0 : i32
    return %c0_i32, %c0_i32_0 : i32, i32
  }
  func.func @transform_5(%arg0: i32) -> (i32, i32) {
    %c0_i32 = arith.constant 0 : i32
    %c0_i32_0 = arith.constant 0 : i32
    %c0_i32_1 = arith.constant 0 : i32
    return %c0_i32, %c0_i32_0 : i32, i32
  }
  func.func @transform_6(%arg0: i32) -> (i32, i32) {
    %c0_i32 = arith.constant 0 : i32
    %c0_i32_0 = arith.constant 0 : i32
    %c0_i32_1 = arith.constant 0 : i32
    return %c0_i32, %c0_i32_0 : i32, i32
  }
  func.func @transform_7(%arg0: i32) -> (i32, i32) {
    %c0_i32 = arith.constant 0 : i32
    %c0_i32_0 = arith.constant 0 : i32
    %c0_i32_1 = arith.constant 0 : i32
    return %c0_i32, %c0_i32_0 : i32, i32
  }
  func.func @transform_8(%arg0: i32) -> (i32, i32) {
    %c0_i32 = arith.constant 0 : i32
    %c0_i32_0 = arith.constant 0 : i32
    %c0_i32_1 = arith.constant 0 : i32
    return %c0_i32, %c0_i32_0 : i32, i32
  }
  func.func @transform_9(%arg0: i32) -> (i32, i32) {
    %c0_i32 = arith.constant 0 : i32
    %c0_i32_0 = arith.constant 0 : i32
    return %arg0, %c0_i32 : i32, i32
  }
}

</mosaic_0001>

<bundles_post_ra>
// kernel: tpu_custom_call.1
= control target key start
LH: loop header
LB: loop body
LE: loop exit
PB: predicated region body
PF: predicated region fallthrough
CT: control target
= control target key end

     0   :  { %14 = vsyncpa [#allocation3], 0  ;;  %s1451_s0 = inlined_call_operand.hbm [shape: f32[16,128], index: 0, kind: input, shape index: {}]   ;;  %s1452_s1 = inlined_call_operand.hbm [shape: bf16[128,128], index: 1, kind: input, shape index: {}]   ;;  %s1453_s2 = inlined_call_operand.hbm [shape: bf16[128,128], index: 2, kind: input, shape index: {}]   ;;  %s1454_s3 = inlined_call_operand.hbm [shape: bf16[128,128], index: 3, kind: input, shape index: {}]   ;;  %s1455_s4 = inlined_call_operand.hbm [shape: bf16[128,128], index: 4, kind: input, shape index: {}]   ;;  %s1456_s5 = inlined_call_operand.hbm [shape: bf16[128,128], index: 5, kind: input, shape index: {}]   ;;  %s1457_s6 = inlined_call_operand.vmem [shape: f32[1,128], index: 6, kind: input, shape index: {}]   ;;  %s1458_s7 = inlined_call_operand.hbm [shape: bf16[128,128], index: 7, kind: input, shape index: {}]   ;;  %s1459_s8 = inlined_call_operand.vmem [shape: f32[1,128], index: 8, kind: input, shape index: {}]   ;;  %s1460_s9 = inlined_call_operand.hbm [shape: f32[16,128], index: 9, kind: output, shape index: {}]  }
   0x1   :  { %15 = vsyncpa [#allocation6], 0 }
   0x2   :  { %16 = vsyncpa [#allocation9], 0 }
   0x3   :  { %17 = vsyncpa [#allocation12], 0  ;;  %s36_s11 = sshll.u32 %s1452_s1, 4  ;;  %s37_s11 = int_to_ptr.hbm [resolvable:$true] %s36_s11 }
   0x4   :  { %18 = vsyncpa [#allocation4], 0  ;;  %s1310_s12 = smov [#allocation5]   ;;  %s62_s16 = sshll.u32 %s1454_s3, 4  ;;  %s63_s16 = int_to_ptr.hbm [resolvable:$true] %s62_s16 }
   0x5   :  { %s38_s13 = sshll.u32 %s1310_s12, 4  ;;  %s1311_s17 = smov 64   ;;  %s39_s13 = int_to_ptr.vmem [resolvable:$true] %s38_s13 }
   0x6   :  { %s1312_s18 = smov 4   ;;  %s1313_s19 = smov [#allocation8]  }
   0x7   :  { %44 = dma.hbm_to_vmem [thread:$0]  %s37_s11, 1024, %s39_s13, [#allocation6], %s1311_s17, %s1311_s17, %s1312_s18  }
   0x8   :  { %s64_s20 = sshll.u32 %s1313_s19, 4  ;;  %s88_s22 = sshll.u32 %s1456_s5, 4  ;;  %s65_s20 = int_to_ptr.vmem [resolvable:$true] %s64_s20  ;;  %s89_s22 = int_to_ptr.hbm [resolvable:$true] %s88_s22 }
   0x9   :  { %70 = dma.hbm_to_vmem [thread:$0]  %s63_s16, 1024, %s65_s20, [#allocation9], %s1311_s17, %s1311_s17, %s1312_s18  }
   0xa   :  { %s23_s24 = sshll.u32 %s1451_s0, 4  ;;  %s1314_s25 = smov [#allocation11]   ;;  %s24_s24 = int_to_ptr.hbm [resolvable:$true] %s23_s24 }
   0xb   :  { %s90_s26 = sshll.u32 %s1314_s25, 4  ;;  %s1315_s27 = smov [#allocation2]   ;;  %s91_s26 = int_to_ptr.vmem [resolvable:$true] %s90_s26 }
   0xc   :  { %96 = dma.hbm_to_vmem [thread:$0]  %s89_s22, 1024, %s91_s26, [#allocation12], %s1311_s17, %s1311_s17, %s1312_s18  }
   0xd   :  { %s25_s5 = sshll.u32 %s1315_s27, 4  ;;  %s1316_s28 = smov 128   ;;  %s26_s5 = int_to_ptr.vmem [resolvable:$true] %s25_s5 }
   0xe   :  { %s1317_s29 = smov 8   ;;  %s49_s0 = sshll.u32 %s1453_s2, 4  ;;  %s50_s0 = int_to_ptr.hbm [resolvable:$true] %s49_s0 }
   0xf   :  { %31 = dma.hbm_to_vmem [thread:$0]  %s24_s24, 256, %s26_s5, [#allocation3], %s1316_s28, %s1316_s28, %s1317_s29  }
  0x10   :  { %s1318_s11 = smov [#allocation7]   ;;  %s75_s15 = sshll.u32 %s1455_s4, 4  ;;  %s76_s15 = int_to_ptr.hbm [resolvable:$true] %s75_s15 }
  0x11   :  { %s51_s12 = sshll.u32 %s1318_s11, 4  ;;  %s1319_s16 = smov [#allocation10]   ;;  %s52_s12 = int_to_ptr.vmem [resolvable:$true] %s51_s12 }
  0x12   :  { %57 = dma.hbm_to_vmem [thread:$0]  %s50_s0, 1024, %s52_s12, [#allocation6], %s1311_s17, %s1311_s17, %s1312_s18  }
  0x13   :  { %s77_s19 = sshll.u32 %s1319_s16, 4  ;;  %s103_s1 = sshll.u32 %s1458_s7, 4  ;;  %s78_s19 = int_to_ptr.vmem [resolvable:$true] %s77_s19  ;;  %s104_s1 = int_to_ptr.hbm [resolvable:$true] %s103_s1 }
  0x14   :  { %83 = dma.hbm_to_vmem [thread:$0]  %s76_s15, 1024, %s78_s19, [#allocation9], %s1311_s17, %s1311_s17, %s1312_s18  }
  0x15   :  { %s1320_s2 = smov [#allocation13]  }
  0x16   :  { %s105_s22 = sshll.u32 %s1320_s2, 4  ;;  %s106_s22 = int_to_ptr.vmem [resolvable:$true] %s105_s22 }
  0x17   :  { %111 = dma.hbm_to_vmem [thread:$0]  %s104_s1, 1024, %s106_s22, [#allocation12], %s1311_s17, %s1311_s17, %s1312_s18  }
  0x18   :  { %1300 = dma.done.wait [#allocation3], 256  }
  0x19   :  { %1301 = vsyncadd [#allocation3], 4294967040 }
  0x1a   :  { %1302 = dma.done.wait [#allocation6], 2048  }
  0x1b   :  { %1303 = vsyncadd [#allocation6], 4294965248 }
  0x1c   :  { %1304 = dma.done.wait [#allocation9], 2048  }
  0x1d   :  { %1305 = vsyncadd [#allocation9], 4294965248 }
  0x1e   :  { %1306 = dma.done.wait [#allocation12], 2048  }
  0x1f   :  { %1307 = vsyncadd [#allocation12], 4294965248  ;;  %v1415_v0 = vld [vmem:[#allocation2] sm:$0xff]  ;;  %v1419_v2 = vld [vmem:[#allocation2 + $0x8] sm:$0xff]  ;;  %v311_v49 = vlaneseq  ;;  %v1321_v57 = vmov 0.0   ;;  %s800_s24 = sshll.u32 %s1460_s9, 4  ;;  %s801_s24 = int_to_ptr.hbm [resolvable:$true] %s800_s24 }
  0x20   :  { %v208_v1 = vmul.f32 %v1415_v0, %v1415_v0  ;;  %v209_v3 = vmul.f32 %v1419_v2, %v1419_v2  ;;  %v1020_v4 = vld [vmem:[#allocation5 + $0x38] sm:$0xff]  ;;  %v1019_v5 = vld [vmem:[#allocation5 + $0x30] sm:$0xff]  ;;  %v1018_v6 = vld [vmem:[#allocation5 + $0x28] sm:$0xff] }
  0x21   :  { %287 = vmatpush.bf16.msra.mxu0 %v1020_v4  ;;  %v1017_v7 = vld [vmem:[#allocation5 + $0x20] sm:$0xff]  ;;  %v1016_v8 = vld [vmem:[#allocation5 + $0x18] sm:$0xff]  ;;  %v1015_v9 = vld [vmem:[#allocation5 + $0x10] sm:$0xff]  ;;  %v312_v54 = vand.u32 127, %v311_v49 }
  0x22   :  { %210 = vadd.xlane.f32.xlu0 %v208_v1  ;;  %v1014_v10 = vld [vmem:[#allocation5 + $0x8] sm:$0xff]  ;;  %v1013_v11 = vld [vmem:[#allocation5] sm:$0xff]  ;;  %v1028_v33 = vld [vmem:[#allocation7 + $0x38] sm:$0xff] }
  0x23   :  { %367 = vmatpush.bf16.msra.mxu1 %v1028_v33  ;;  %v1027_v34 = vld [vmem:[#allocation7 + $0x30] sm:$0xff]  ;;  %v1026_v37 = vld [vmem:[#allocation7 + $0x28] sm:$0xff]  ;;  %v1025_v38 = vld [vmem:[#allocation7 + $0x20] sm:$0xff]  ;;  %vm313_vm6 = vcmp.lt.s32.totalorder %v312_v54, 32 }
  0x24   :  { %v1024_v39 = vld [vmem:[#allocation7 + $0x18] sm:$0xff]  ;;  %v1023_v40 = vld [vmem:[#allocation7 + $0x10] sm:$0xff]  ;;  %v1022_v41 = vld [vmem:[#allocation7 + $0x8] sm:$0xff]  ;;  %v848_v58 = vsel %vm313_vm6, 1.0, %v1321_v57 }
  0x25   :  { %288 = vmatpush.bf16.msra.mxu0 %v1019_v5  ;;  %v1021_v42 = vld [vmem:[#allocation7] sm:$0xff]  ;;  %v1036_v43 = vld [vmem:[#allocation8 + $0x38] sm:$0xff]  ;;  %v1035_v44 = vld [vmem:[#allocation8 + $0x30] sm:$0xff] }
  0x26   :  { %431 = vmatpush.bf16.msra.mxu2 %v1036_v43  ;;  %v1034_v45 = vld [vmem:[#allocation8 + $0x28] sm:$0xff]  ;;  %v1033_v47 = vld [vmem:[#allocation8 + $0x20] sm:$0xff]  ;;  %v1032_v50 = vld [vmem:[#allocation8 + $0x18] sm:$0xff] }
  0x27   :  { %368 = vmatpush.bf16.msra.mxu1 %v1027_v34  ;;  %v1031_v63 = vld [vmem:[#allocation8 + $0x10] sm:$0xff]  ;;  %v1030_v1 = vld [vmem:[#allocation8 + $0x8] sm:$0xff]  ;;  %v1044_v4 = vld [vmem:[#allocation10 + $0x38] sm:$0xff] }
  0x28   :  { %498 = vmatpush.bf16.msra.mxu3 %v1044_v4  ;;  %v1043_v5 = vld [vmem:[#allocation10 + $0x30] sm:$0xff]  ;;  %v1050_v33 = vld [vmem:[#allocation11 + $0x28] sm:$0xff]  ;;  %v1048_v34 = vld [vmem:[#allocation11 + $0x18] sm:$0xff] }
  0x29   :  { %289 = vmatpush.bf16.msra.mxu0 %v1018_v6  ;;  %v1042_v6 = vld [vmem:[#allocation10 + $0x28] sm:$0xff] }
  0x2a   :  { %212 = vadd.xlane.f32.xlu0 %v209_v3  ;;  %432 = vmatpush.bf16.msra.mxu2 %v1035_v44  ;;  %v1029_v3 = vld [vmem:[#allocation8] sm:$0xff] }
  0x2b   :  { %369 = vmatpush.bf16.msra.mxu1 %v1026_v37 }
  0x2c   :  { %499 = vmatpush.bf16.msra.mxu3 %v1043_v5  ;;  %v1054_v5 = vld [vmem:[#allocation13 + $0x8] sm:$0xff] }
  0x2d   :  { %290 = vmatpush.bf16.msra.mxu0 %v1017_v7 }
  0x2e   :  { %433 = vmatpush.bf16.msra.mxu2 %v1034_v45 }
  0x2f   :  { %370 = vmatpush.bf16.msra.mxu1 %v1025_v38 }
  0x30   :  { %500 = vmatpush.bf16.msra.mxu3 %v1042_v6 }
  0x31   :  { %291 = vmatpush.bf16.msra.mxu0 %v1016_v8 }
  0x32   :  { %434 = vmatpush.bf16.msra.mxu2 %v1033_v47 }
  0x33   :  { %371 = vmatpush.bf16.msra.mxu1 %v1024_v39 }
  0x35   :  { %292 = vmatpush.bf16.msra.mxu0 %v1015_v9 }
  0x36   :  { %435 = vmatpush.bf16.msra.mxu2 %v1032_v50 }
  0x37   :  { %372 = vmatpush.bf16.msra.mxu1 %v1023_v40 }
  0x39   :  { %293 = vmatpush.bf16.msra.mxu0 %v1014_v10  ;;  %v1041_v10 = vld [vmem:[#allocation10 + $0x20] sm:$0xff] }
  0x3a   :  { %436 = vmatpush.bf16.msra.mxu2 %v1031_v63  ;;  %501 = vmatpush.bf16.msra.mxu3 %v1041_v10  ;;  %v1074_v63 = vld [vmem:[%s1457_s6] ss:$0 sm:$0xff] }
  0x3b   :  { %373 = vmatpush.bf16.msra.mxu1 %v1022_v41 }
  0x3d   :  { %294 = vmatpush.bf16.msra.mxu0 %v1013_v11  ;;  %v1040_v11 = vld [vmem:[#allocation10 + $0x18] sm:$0xff] }
  0x3e   :  { %437 = vmatpush.bf16.msra.mxu2 %v1030_v1  ;;  %502 = vmatpush.bf16.msra.mxu3 %v1040_v11  ;;  %v1055_v1 = vld [vmem:[#allocation13 + $0x10] sm:$0xff] }
  0x3f   :  { %374 = vmatpush.bf16.msra.mxu1 %v1021_v42 }
  0x42   :  { %438 = vmatpush.bf16.msra.mxu2 %v1029_v3 }
  0x95   :  { %v211_v12 = vpop.xlane.xlu0 %210 }
  0x96   :  { %v214_v13 = vmul.f32 0.03125, %v211_v12  ;;  %v1039_v12 = vld [vmem:[#allocation10 + $0x10] sm:$0xff] }
  0x97   :  { %503 = vmatpush.bf16.msra.mxu3 %v1039_v12 }
  0x98   :  { %1076 = vrsqrt.f32 %v214_v13  ;;  %vm222_vm1 = vweird.f32 %v214_v13 }
  0x9d   :  { %v213_v14 = vpop.xlane.xlu0 %212 }
  0x9e   :  { %v1077_v15 = vpop.eup %1076  ;;  %v215_v16 = vmul.f32 0.03125, %v213_v14  ;;  %v1037_v14 = vld [vmem:[#allocation10] sm:$0xff] }
  0x9f   :  { %v217_v17 = vmul.f32 %v1077_v15, %v214_v13  ;;  %vm223_vm0 = vweird.f32 %v1077_v15  ;;  %v1038_v13 = vld [vmem:[#allocation10 + $0x8] sm:$0xff] }
  0xa0   :  { %1078 = vrsqrt.f32 %v215_v16  ;;  %vm224_vm3 = vmor %vm222_vm1, %vm223_vm0  ;;  %vm232_vm4 = vweird.f32 %v215_v16  ;;  %504 = vmatpush.bf16.msra.mxu3 %v1038_v13 }
  0xa1   :  { %v218_v18 = vmul.f32 %v1077_v15, %v217_v17 }
  0xa3   :  { %v219_v19 = vmul.f32 0.5, %v218_v18 }
  0xa4   :  { %505 = vmatpush.bf16.msra.mxu3 %v1037_v14 }
  0xa5   :  { %v220_v21 = vsub.f32 1.5, %v219_v19 }
  0xa6   :  { %v1079_v20 = vpop.eup %1078 }
  0xa7   :  { %v227_v22 = vmul.f32 %v1079_v20, %v215_v16  ;;  %v221_v25 = vmul.f32 %v1077_v15, %v220_v21  ;;  %vm233_vm2 = vweird.f32 %v1079_v20  ;;  %v382_v16 = vsub.f32 1.0, %v848_v58 }
  0xa8   :  { %vm234_vm5 = vmor %vm232_vm4, %vm233_vm2 }
  0xa9   :  { %v228_v23 = vmul.f32 %v1079_v20, %v227_v22  ;;  %v225_v27 = vsel %vm224_vm3, %v1077_v15, %v221_v25 }
  0xaa   :  { %v236_v30 = vmul.f32 %v225_v27, %v1415_v0 }
  0xab   :  { %v229_v24 = vmul.f32 0.5, %v228_v23 }
  0xad   :  { %v230_v26 = vsub.f32 1.5, %v229_v24 }
  0xaf   :  { %v231_v28 = vmul.f32 %v1079_v20, %v230_v26 }
  0xb1   :  { %v235_v29 = vsel %vm234_vm5, %v1079_v20, %v231_v28 }
  0xb2   :  { %v237_v31 = vmul.f32 %v235_v29, %v1419_v2 }
  0xb4   :  { %v238_v32 = vpack.c.bf16 %v237_v31, %v236_v30  ;;  %v1052_v31 = vld [vmem:[#allocation11 + $0x38] sm:$0xff] }
  0xb5   :  { %613 = vmatpush.bf16.msrb.mxu0 %v1052_v31 }
  0xb6   :  { %295 = vmatmul.bf16.vlgmr.msra.gmra.mxu0 %v238_v32  ;;  %v1051_v32 = vld [vmem:[#allocation11 + $0x30] sm:$0xff] }
  0xb9   :  { %614 = vmatpush.bf16.msrb.mxu0 %v1051_v32 }
  0xbd   :  { %615 = vmatpush.bf16.msrb.mxu0 %v1050_v33 }
 0x133   :  { %v296_v35 = vpop.f32.mrf.mxu0 }
 0x134   :  { %301 = vmax.xlane.f32.xlu1 %v296_v35 }
 0x13b   :  { %v298_v36 = vpop.f32.mrf.mxu0 }
 0x13c   :  { %303 = vmax.xlane.f32.xlu1 %v298_v36 }
 0x1a7   :  { %v302_v46 = vpop.xlane.xlu1 %301 }
 0x1a8   :  { %v305_v48 = vsub.f32 %v296_v35, %v302_v46  ;;  %v1047_v35 = vld [vmem:[#allocation11 + $0x10] sm:$0xff] }
 0x1aa   :  { %v307_v51 = vmul.f32 1.442695, %v305_v48 }
 0x1ac   :  { %1080 = vpow2.f32 %v307_v51 }
 0x1af   :  { %v304_v52 = vpop.xlane.xlu1 %303 }
 0x1b0   :  { %v306_v53 = vsub.f32 %v298_v36, %v304_v52  ;;  %v1046_v36 = vld [vmem:[#allocation11 + $0x8] sm:$0xff] }
 0x1b2   :  { %v309_v55 = vmul.f32 1.442695, %v306_v53  ;;  %v1081_v56 = vpop.eup %1080 }
 0x1b3   :  { %v316_v60 = vmul.f32 %v1081_v56, %v848_v58 }
 0x1b4   :  { %1082 = vpow2.f32 %v309_v55 }
 0x1ba   :  { %v1083_v59 = vpop.eup %1082 }
 0x1bb   :  { %v317_v61 = vmul.f32 %v1083_v59, %v848_v58  ;;  %v1060_v58 = vld [vmem:[#allocation13 + $0x38] sm:$0xff]  ;;  %v1059_v59 = vld [vmem:[#allocation13 + $0x30] sm:$0xff] }
 0x1bc   :  { %736 = vmatpush.bf16.msrb.mxu1 %v1060_v58 }
 0x1bd   :  { %v318_v62 = vpack.c.bf16 %v317_v61, %v316_v60 }
 0x1bf   :  { %375 = vmatmul.bf16.vlgmr.msra.gmra.mxu1 %v318_v62  ;;  %v1056_v62 = vld [vmem:[#allocation13 + $0x18] sm:$0xff] }
 0x1c0   :  { %737 = vmatpush.bf16.msrb.mxu1 %v1059_v59 }
 0x23c   :  { %v376_v7 = vpop.f32.mrf.mxu1 }
 0x244   :  { %v378_v8 = vpop.f32.mrf.mxu1 }
 0x245   :  { %v381_v9 = vpack.c.bf16 %v378_v8, %v376_v7  ;;  %v1053_v7 = vld [vmem:[#allocation13] sm:$0xff] }
 0x247   :  { %439 = vmatmul.bf16.vlgmr.msra.gmra.mxu2 %v381_v9 }
 0x2ca   :  { %v440_v15 = vpop.f32.mrf.mxu2 }
 0x2cb   :  { %v441_v17 = vadd.f32 %v440_v15, %v382_v16 }
 0x2cd   :  { %1084 = vrcp.f32 %v441_v17 }
 0x2d2   :  { %v442_v18 = vpop.f32.mrf.mxu2 }
 0x2d3   :  { %v443_v19 = vadd.f32 %v442_v18, %v382_v16  ;;  %v1085_v20 = vpop.eup %1084 }
 0x2d4   :  { %v447_v22 = vmul.f32 %v1085_v20, %v316_v60  ;;  %v1058_v60 = vld [vmem:[#allocation13 + $0x28] sm:$0xff] }
 0x2d5   :  { %1086 = vrcp.f32 %v443_v19  ;;  %738 = vmatpush.bf16.msrb.mxu1 %v1058_v60 }
 0x2db   :  { %v1087_v21 = vpop.eup %1086 }
 0x2dc   :  { %v448_v23 = vmul.f32 %v1087_v21, %v317_v61  ;;  %v1057_v61 = vld [vmem:[#allocation13 + $0x20] sm:$0xff] }
 0x2dd   :  { %739 = vmatpush.bf16.msrb.mxu1 %v1057_v61 }
 0x2de   :  { %v449_v24 = vpack.c.bf16 %v448_v23, %v447_v22 }
 0x2e0   :  { %506 = vmatmul.bf16.vlgmr.msra.gmra.mxu3 %v449_v24 }
 0x2e1   :  { %740 = vmatpush.bf16.msrb.mxu1 %v1056_v62 }
 0x2e5   :  { %741 = vmatpush.bf16.msrb.mxu1 %v1055_v1 }
 0x2e9   :  { %742 = vmatpush.bf16.msrb.mxu1 %v1054_v5 }
 0x2ed   :  { %743 = vmatpush.bf16.msrb.mxu1 %v1053_v7 }
 0x363   :  { %v507_v25 = vpop.f32.mrf.mxu3 }
 0x364   :  { %v1426_v26 = vadd.f32 %v507_v25, %v1415_v0  ;;  %v1049_v0 = vld [vmem:[#allocation11 + $0x20] sm:$0xff] }
 0x365   :  { %616 = vmatpush.bf16.msrb.mxu0 %v1049_v0 }
 0x366   :  { %v514_v27 = vmul.f32 %v1426_v26, %v1426_v26 }
 0x368   :  { %516 = vadd.xlane.f32.xlu2 %v514_v27 }
 0x369   :  { %617 = vmatpush.bf16.msrb.mxu0 %v1048_v34 }
 0x36b   :  { %v509_v28 = vpop.f32.mrf.mxu3 }
 0x36c   :  { %v1431_v29 = vadd.f32 %v509_v28, %v1419_v2  ;;  %v1045_v2 = vld [vmem:[#allocation11] sm:$0xff] }
 0x36d   :  { %618 = vmatpush.bf16.msrb.mxu0 %v1047_v35 }
 0x36e   :  { %v515_v30 = vmul.f32 %v1431_v29, %v1431_v29 }
 0x370   :  { %518 = vadd.xlane.f32.xlu2 %v515_v30 }
 0x371   :  { %619 = vmatpush.bf16.msrb.mxu0 %v1046_v36 }
 0x375   :  { %620 = vmatpush.bf16.msrb.mxu0 %v1045_v2 }
 0x3db   :  { %v517_v37 = vpop.xlane.xlu2 %516 }
 0x3dc   :  { %v520_v38 = vmul.f32 0.03125, %v517_v37 }
 0x3de   :  { %1088 = vrsqrt.f32 %v520_v38  ;;  %vm528_vm8 = vweird.f32 %v520_v38 }
 0x3e3   :  { %v519_v39 = vpop.xlane.xlu2 %518 }
 0x3e4   :  { %v1089_v40 = vpop.eup %1088  ;;  %v521_v41 = vmul.f32 0.03125, %v519_v39 }
 0x3e5   :  { %v523_v42 = vmul.f32 %v1089_v40, %v520_v38  ;;  %vm529_vm7 = vweird.f32 %v1089_v40  ;;  %v1075_v38 = vld [vmem:[%s1459_s8] ss:$0 sm:$0xff]  ;;  %s1322_s8 = smov [#allocation14]  }
 0x3e6   :  { %1090 = vrsqrt.f32 %v521_v41  ;;  %vm530_vm10 = vmor %vm528_vm8, %vm529_vm7  ;;  %vm538_vm11 = vweird.f32 %v521_v41  ;;  %s798_s18 = sshll.u32 %s1322_s8, 4  ;;  %s799_s18 = int_to_ptr.vmem [resolvable:$true] %s798_s18 }
 0x3e7   :  { %v524_v43 = vmul.f32 %v1089_v40, %v523_v42 }
 0x3e9   :  { %v525_v44 = vmul.f32 0.5, %v524_v43 }
 0x3eb   :  { %v526_v46 = vsub.f32 1.5, %v525_v44 }
 0x3ec   :  { %v1091_v45 = vpop.eup %1090 }
 0x3ed   :  { %v533_v47 = vmul.f32 %v1091_v45, %v521_v41  ;;  %v527_v49 = vmul.f32 %v1089_v40, %v526_v46  ;;  %vm539_vm9 = vweird.f32 %v1091_v45 }
 0x3ee   :  { %vm540_vm12 = vmor %vm538_vm11, %vm539_vm9 }
 0x3ef   :  { %v534_v48 = vmul.f32 %v1091_v45, %v533_v47  ;;  %v531_v53 = vsel %vm530_vm10, %v1089_v40, %v527_v49 }
 0x3f0   :  { %v542_v55 = vmul.f32 %v531_v53, %v1426_v26 }
 0x3f1   :  { %v535_v50 = vmul.f32 0.5, %v534_v48 }
 0x3f3   :  { %v536_v51 = vsub.f32 1.5, %v535_v50 }
 0x3f5   :  { %v537_v52 = vmul.f32 %v1091_v45, %v536_v51 }
 0x3f7   :  { %v541_v54 = vsel %vm540_vm12, %v1091_v45, %v537_v52 }
 0x3f8   :  { %v543_v56 = vmul.f32 %v541_v54, %v1431_v29 }
 0x3fa   :  { %v544_v57 = vpack.c.bf16 %v543_v56, %v542_v55 }
 0x3fc   :  { %621 = vmatmul.bf16.vlgmr.msrb.gmra.mxu0 %v544_v57 }
 0x479   :  { %v622_v3 = vpop.f32.mrf.mxu0 }
 0x47a   :  { %v623_v4 = vadd.f32 %v1074_v63, %v622_v3 }
 0x47c   :  { %v977_v6 = vmul.f32 -1.442695, %v623_v4 }
 0x47e   :  { %1092 = vpow2.f32 %v977_v6 }
 0x481   :  { %v624_v8 = vpop.f32.mrf.mxu0 }
 0x482   :  { %v625_v9 = vadd.f32 %v1074_v63, %v624_v8 }
 0x484   :  { %v1093_v10 = vpop.eup %1092  ;;  %v978_v11 = vmul.f32 -1.442695, %v625_v9 }
 0x485   :  { %v633_v12 = vadd.f32 1.0, %v1093_v10 }
 0x486   :  { %1094 = vpow2.f32 %v978_v11 }
 0x487   :  { %1096 = vrcp.f32 %v633_v12  ;;  %v646_v22 = vand.u32 2147483648, %v633_v12  ;;  %vm640_vm14 = vweird.f32 %v633_v12  ;;  %v644_v23 = vand.u32 2147483647, %v633_v12 }
 0x489   :  { %v647_v31 = vor.u32 1.1754944e-38, %v646_v22  ;;  %vm645_vm1 = vcmp.eq.f32.partialorder %v644_v23, 8.507059e+37 }
 0x48c   :  { %v1095_v13 = vpop.eup %1094 }
 0x48d   :  { %v1097_v14 = vpop.eup %1096  ;;  %v634_v15 = vadd.f32 1.0, %v1095_v13 }
 0x48e   :  { %v636_v16 = vmul.f32 %v1097_v14, %v633_v12  ;;  %vm641_vm13 = vweird.f32 %v1097_v14 }
 0x48f   :  { %1098 = vrcp.f32 %v634_v15  ;;  %vm642_vm15 = vmor %vm640_vm14, %vm641_vm13  ;;  %v661_v25 = vand.u32 2147483648, %v634_v15  ;;  %v659_v30 = vand.u32 2147483647, %v634_v15  ;;  %vm655_vm2 = vweird.f32 %v634_v15 }
 0x490   :  { %v637_v17 = vsub.f32 1.0, %v636_v16 }
 0x491   :  { %v662_v0 = vor.u32 1.1754944e-38, %v661_v25  ;;  %vm660_vm4 = vcmp.eq.f32.partialorder %v659_v30, 8.507059e+37 }
 0x492   :  { %v638_v18 = vmul.f32 %v1097_v14, %v637_v17 }
 0x494   :  { %v639_v20 = vadd.f32 %v1097_v14, %v638_v18 }
 0x495   :  { %v1099_v19 = vpop.eup %1098 }
 0x496   :  { %v651_v21 = vmul.f32 %v1099_v19, %v634_v15  ;;  %v643_v27 = vsel %vm642_vm15, %v1097_v14, %v639_v20  ;;  %vm656_vm0 = vweird.f32 %v1099_v19 }
 0x497   :  { %v648_v33 = vsel %vm645_vm1, %v647_v31, %v643_v27  ;;  %vm657_vm3 = vmor %vm655_vm2, %vm656_vm0 }
 0x498   :  { %v652_v24 = vsub.f32 1.0, %v651_v21  ;;  %v665_v36 = vmul.f32 %v648_v33, %v623_v4 }
 0x49a   :  { %v653_v28 = vmul.f32 %v1099_v19, %v652_v24 }
 0x49c   :  { %v654_v32 = vadd.f32 %v1099_v19, %v653_v28 }
 0x49e   :  { %v658_v34 = vsel %vm657_vm3, %v1099_v19, %v654_v32 }
 0x49f   :  { %v663_v35 = vsel %vm660_vm4, %v662_v0, %v658_v34 }
 0x4a0   :  { %v666_v2 = vmul.f32 %v663_v35, %v625_v9 }
 0x4a2   :  { %v667_v37 = vpack.c.bf16 %v666_v2, %v665_v36 }
 0x4a4   :  { %744 = vmatmul.bf16.vlgmr.msrb.gmra.mxu1 %v667_v37 }
 0x521   :  { %v745_v39 = vpop.f32.mrf.mxu1 }
 0x522   :  { %v746_v40 = vadd.f32 %v1075_v38, %v745_v39 }
 0x524   :  { %v1011_v41 = vmul.f32 -1.442695, %v746_v40 }
 0x526   :  { %1100 = vpow2.f32 %v1011_v41 }
 0x529   :  { %v747_v42 = vpop.f32.mrf.mxu1 }
 0x52a   :  { %v748_v43 = vadd.f32 %v1075_v38, %v747_v42 }
 0x52c   :  { %v1101_v44 = vpop.eup %1100  ;;  %v1012_v45 = vmul.f32 -1.442695, %v748_v43 }
 0x52d   :  { %v756_v46 = vadd.f32 1.0, %v1101_v44 }
 0x52e   :  { %1102 = vpow2.f32 %v1012_v45 }
 0x52f   :  { %1104 = vrcp.f32 %v756_v46  ;;  %v769_v52 = vand.u32 2147483648, %v756_v46  ;;  %v767_v54 = vand.u32 2147483647, %v756_v46  ;;  %vm763_vm6 = vweird.f32 %v756_v46 }
 0x531   :  { %v770_v57 = vor.u32 1.1754944e-38, %v769_v52  ;;  %vm768_vm8 = vcmp.eq.f32.partialorder %v767_v54, 8.507059e+37 }
 0x534   :  { %v1103_v47 = vpop.eup %1102 }
 0x535   :  { %v1105_v48 = vpop.eup %1104  ;;  %v757_v49 = vadd.f32 1.0, %v1103_v47 }
 0x536   :  { %v759_v50 = vmul.f32 %v1105_v48, %v756_v46  ;;  %vm764_vm5 = vweird.f32 %v1105_v48 }
 0x537   :  { %1106 = vrcp.f32 %v757_v49  ;;  %vm765_vm7 = vmor %vm763_vm6, %vm764_vm5  ;;  %v784_v63 = vand.u32 2147483648, %v757_v49  ;;  %v782_v4 = vand.u32 2147483647, %v757_v49  ;;  %vm778_vm10 = vweird.f32 %v757_v49 }
 0x538   :  { %v760_v51 = vsub.f32 1.0, %v759_v50 }
 0x539   :  { %v785_v6 = vor.u32 1.1754944e-38, %v784_v63  ;;  %vm783_vm12 = vcmp.eq.f32.partialorder %v782_v4, 8.507059e+37 }
 0x53a   :  { %v761_v53 = vmul.f32 %v1105_v48, %v760_v51 }
 0x53c   :  { %v762_v55 = vadd.f32 %v1105_v48, %v761_v53 }
 0x53d   :  { %v1107_v56 = vpop.eup %1106 }
 0x53e   :  { %v766_v58 = vsel %vm765_vm7, %v1105_v48, %v762_v55  ;;  %v774_v59 = vmul.f32 %v1107_v56, %v757_v49  ;;  %vm779_vm9 = vweird.f32 %v1107_v56 }
 0x53f   :  { %v771_v60 = vsel %vm768_vm8, %v770_v57, %v766_v58  ;;  %vm780_vm11 = vmor %vm778_vm10, %vm779_vm9 }
 0x540   :  { %v788_v61 = vmul.f32 %v771_v60, %v746_v40  ;;  %v775_v62 = vsub.f32 1.0, %v774_v59 }
 0x542   :  { %v790_v1 = vadd.f32 %v788_v61, %v1426_v26  ;;  %v776_v3 = vmul.f32 %v1107_v56, %v775_v62 }
 0x544   :  { %792 = vst [vmem:[#allocation14] sm:$0xff] %v790_v1  ;;  %v777_v5 = vadd.f32 %v1107_v56, %v776_v3 }
 0x546   :  { %v781_v7 = vsel %vm780_vm11, %v1107_v56, %v777_v5 }
 0x547   :  { %v786_v8 = vsel %vm783_vm12, %v785_v6, %v781_v7 }
 0x548   :  { %v789_v9 = vmul.f32 %v786_v8, %v748_v43 }
 0x54a   :  { %v791_v26 = vadd.f32 %v789_v9, %v1431_v29 }
 0x54c   :  { %793 = vst [vmem:[#allocation14 + $0x8] sm:$0xff] %v791_v26 }
 0x54d   :  { %806 = dma.vmem_to_hbm [thread:$0]  %s799_s18, 256, %s801_s24, [#allocation4], %s1316_s28, %s1316_s28, %s1317_s29  }
 0x54e   :  { %1308 = dma.done.wait [#allocation4], 256  }
 0x54f   :  { %1309 = vsyncadd [#allocation4], 4294967040 }
 0x550   :  { %811 = vsyncpa [#allocation3], 1 }
 0x551   :  { %812 = vsyncpa [#allocation6], 1 }
 0x552   :  { %813 = vsyncpa [#allocation9], 1 }
 0x553   :  { %814 = vsyncpa [#allocation12], 1 }
 0x554   :  { %815 = vsyncpa [#allocation4], 1 }

</bundles_post_ra>
